<compile_context>
chip_gen: v6e
topology: v6e:2x2x1
jax: 0.10.0
libtpu: 0.0.40
codegen_flags: <defaults>
</compile_context>

<pallas_src>
import functools

import jax
import jax.numpy as jnp
from jax.experimental import pallas as pl
from jax.experimental.pallas import tpu as pltpu


def _round_up(v, m):
    return (v + m - 1) // m * m


def _round_down(v, m):
    return (v // m) * m


def _vmem_capacity_bytes():
    try:
        return int(pltpu.get_tpu_info().vmem_capacity_bytes)
    except Exception:
        return 64 * 1024 * 1024  # conservative fallback (v7x-sized VMEM)


def _gate_kernel(x_ref, wt_ref, o_ref, *, cast_x_f32, normalize_gate):
    x = x_ref[...]            # (TM, D) tile of tokens
    w = wt_ref[...]           # (D, E_pad) transposed weight (grid-resident)

    if cast_x_f32 and x.dtype != jnp.float32:
        x = x.astype(jnp.float32)   # strict torch .float() parity path only

    # (TM, D) @ (D, E_pad) on the MXU with f32 accumulation.
    logits = jnp.dot(x, w, preferred_element_type=jnp.float32)

    if normalize_gate:
        # torch F.normalize(x, p=2, dim=-1) == x / max(||x||_2, 1e-12).
        # Applied as a post-matmul per-row scale of the small (TM, E) logits:
        #   (x / max(||x||, eps)) @ W == (x @ W) * rsqrt(max(||x||^2, eps^2))
        # Squared-sum accumulates in f32 without materializing an f32 copy of x.
        sq = jnp.sum(x * x, axis=-1, keepdims=True, dtype=jnp.float32)  # (TM, 1)
        scale = jax.lax.rsqrt(jnp.maximum(sq, 1e-24))                   # EUP slot
        logits = logits * scale

    o_ref[...] = logits.astype(o_ref.dtype)


def linear_topk_gate(x, wg_weight, top_k, *, fp32_gate=False,
                     normalize_gate=False, strict_fp32_operands=False,
                     tile_m=None):
    """Pallas implementation of LinearTopKGate.forward.

    x:         (..., model_dim)
    wg_weight: (num_global_experts, model_dim)
    returns:   (logits with shape (..., num_global_experts), top_k)
    """
    orig_shape = x.shape
    model_dim = orig_shape[-1]
    num_experts = wg_weight.shape[0]

    x2d = x.reshape(-1, model_dim)            # [tokens, model_dim]
    n_tokens = x2d.shape[0]

    cast_x_f32 = bool(fp32_gate and strict_fp32_operands)

    # Pre-transpose weight once: (E, D) -> (D, E_pad); expert axis zero-padded to a
    # lane multiple so output stores are lane-dense (unmasked vst).
    e_pad = _round_up(num_experts, 128)
    wt = wg_weight.T
    if fp32_gate and strict_fp32_operands:
        wt = wt.astype(jnp.float32)
    if e_pad != num_experts:
        wt = jnp.pad(wt, ((0, 0), (0, e_pad - num_experts)))

    x_itemsize = x2d.dtype.itemsize
    w_itemsize = wt.dtype.itemsize
    out_dtype = jnp.float32 if fp32_gate else x.dtype
    out_itemsize = jnp.dtype(out_dtype).itemsize

    # Packed sublane count: 8 rows for 4-byte, 16 for 2-byte, 32 for 1-byte dtypes.
    sublane = max(8, 32 // x_itemsize)

    # ---- generation-aware VMEM budget -> token tile size --------------------
    vmem_cap = _vmem_capacity_bytes()
    budget = int(0.70 * vmem_cap)             # leave compiler/scratch headroom

    w_vmem = model_dim * e_pad * w_itemsize   # resident weight (single-buffered)
    per_row = (2 * model_dim * x_itemsize     # x tile, double-buffered
               + 2 * e_pad * out_itemsize     # out tile, double-buffered
               + e_pad * 4)                   # f32 logits held before the store cast
    if cast_x_f32 and x_itemsize < 4:
        per_row += model_dim * 4              # in-kernel f32 copy of x
    if normalize_gate:
        per_row += model_dim * x_itemsize     # x*x temporary

    tile_cap = 512 if vmem_cap <= 64 * 1024 * 1024 else 1024

    if tile_m is None:
        fit = _round_down(max(budget - w_vmem, 0) // max(per_row, 1), sublane)
        tile_m = min(tile_cap, max(sublane, fit))
        # Keep >= 2 grid steps when possible so both v7x TensorCores get work
        # (negligible cost on single-core v5e/v6e).
        two_step = _round_up(pl.cdiv(n_tokens, 2), sublane)
        tile_m = min(tile_m, max(sublane, two_step))
    tile_m = max(sublane, _round_up(int(tile_m), sublane))
    tile_m = min(tile_m, _round_up(n_tokens, sublane))

    grid = (pl.cdiv(n_tokens, tile_m),)

    # VMEM limit: never clamp below the true working set (weight counted twice as
    # headroom in case the single-buffer request is not honored).
    working = 2 * w_vmem + tile_m * per_row
    vmem_limit = min(int(0.95 * vmem_cap),
                     max(int(1.5 * working), 32 * 1024 * 1024))

    # Advisory cost estimate (mem-bound gate).
    cost = pl.CostEstimate(
        flops=2 * n_tokens * model_dim * e_pad,
        transcendentals=n_tokens if normalize_gate else 0,
        bytes_accessed=(n_tokens * model_dim * x_itemsize
                        + model_dim * e_pad * w_itemsize
                        + n_tokens * e_pad * out_itemsize))

    kernel = functools.partial(_gate_kernel, cast_x_f32=cast_x_f32,
                               normalize_gate=normalize_gate)

    logits = pl.pallas_call(
        kernel,
        out_shape=jax.ShapeDtypeStruct((n_tokens, e_pad), out_dtype),
        grid_spec=pltpu.PrefetchScalarGridSpec(
            num_scalar_prefetch=0,
            grid=grid,
            in_specs=[
                pl.BlockSpec((tile_m, model_dim), lambda i: (i, 0)),
                # Whole (D, E_pad) weight, constant across the grid -> single buffer.
                pl.BlockSpec((model_dim, e_pad), lambda i: (0, 0),
                             pipeline_mode=pl.Buffered(1)),
            ],
            out_specs=pl.BlockSpec((tile_m, e_pad), lambda i: (i, 0)),
        ),
        compiler_params=pltpu.CompilerParams(
            dimension_semantics=("parallel",),
            vmem_limit_bytes=int(vmem_limit)),
        cost_estimate=cost,
    )(x2d, wt)

    logits = logits[:, :num_experts]
    logits = logits.reshape(*orig_shape[:-1], num_experts)
    return logits, top_k


if __name__ == "__main__":
    # Module config (small, deterministic).
    model_dim = 32
    num_global_experts = 8
    k = 2
    fp32_gate = True
    normalize_gate = True
    top_k = min(num_global_experts, int(k))

    key = jax.random.PRNGKey(0)
    kx, kw = jax.random.split(key)

    # Inputs: batch=2, seq=8, hidden=32 -> 16 tokens.
    x = jax.random.normal(kx, (2, 8, model_dim), dtype=jnp.float32)

    # Deterministic init of the wg weight (nn.Linear-like uniform init).
    bound = 1.0 / (model_dim ** 0.5)
    wg_weight = jax.random.uniform(
        kw, (num_global_experts, model_dim),
        minval=-bound, maxval=bound, dtype=jnp.float32)

    logits, returned_k = linear_topk_gate(
        x, wg_weight, top_k,
        fp32_gate=fp32_gate, normalize_gate=normalize_gate)
    logits = jax.block_until_ready(logits)

    # Pure-JAX reference check.
    xr = x / jnp.maximum(
        jnp.sqrt(jnp.sum(x * x, axis=-1, keepdims=True)), 1e-12)
    ref = jnp.einsum("bsd,ed->bse", xr.astype(jnp.float32),
                     wg_weight.astype(jnp.float32))
    assert logits.shape == (2, 8, num_global_experts)
    assert returned_k == top_k
    assert jnp.allclose(logits, ref, atol=1e-5, rtol=1e-5)

    print("KERNEL_OK")
</pallas_src>

<mosaic_0001>
module attributes {stable_mosaic.version = 11 : i64} {
  func.func @_gate_kernel(%arg0: i32, %arg1: memref<8x32xf32, #tpu.memory_space<vmem>>, %arg2: memref<32x128xf32, #tpu.memory_space<vmem>>, %arg3: memref<8x128xf32, #tpu.memory_space<vmem>>) attributes {dimension_semantics = [#tpu.dimension_semantics<parallel>], iteration_bounds = array<i64: 2>, scalar_prefetch = 0 : i64, scratch_operands = 0 : i64, tpu.core_type = #tpu.core_type<tc>, window_params = [{transform_indices = @transform_0, window_bounds = array<i64: 8, 32>}, {pipeline_mode = #tpu.pipeline_mode<synchronous>, transform_indices = @transform_1, window_bounds = array<i64: 32, 128>}, {transform_indices = @transform_2, window_bounds = array<i64: 8, 128>}]} {
    %c0 = arith.constant 0 : index
    %c0_0 = arith.constant 0 : index
    %0 = vector.load %arg1[%c0, %c0_0] : memref<8x32xf32, #tpu.memory_space<vmem>>, vector<8x32xf32>
    %c0_1 = arith.constant 0 : index
    %c0_2 = arith.constant 0 : index
    %1 = vector.load %arg2[%c0_1, %c0_2] : memref<32x128xf32, #tpu.memory_space<vmem>>, vector<32x128xf32>
    %cst = arith.constant dense<0.000000e+00> : vector<8x128xf32>
    %2 = tpu.matmul %0, %1, %cst {dimension_numbers = #tpu.dot_dimension_numbers<[1], [0], [0], [1], [0, 0, 1, 1], [], []>} : vector<8x32xf32>, vector<32x128xf32>, vector<8x128xf32> -> vector<8x128xf32>
    %3 = arith.mulf %0, %0 : vector<8x32xf32>
    %cst_3 = arith.constant dense<0.000000e+00> : vector<8xf32>
    %4 = vector.multi_reduction <add>, %3, %cst_3 [1] : vector<8x32xf32> to vector<8xf32>
    %5 = vector.shape_cast %4 : vector<8xf32> to vector<8x1xf32>
    %cst_4 = arith.constant 1.000000e-24 : f32
    %6 = vector.broadcast %cst_4 : f32 to vector<8x1xf32>
    %7 = arith.maximumf %5, %6 : vector<8x1xf32>
    %8 = math.rsqrt %7 : vector<8x1xf32>
    %9 = vector.broadcast %8 : vector<8x1xf32> to vector<8x128xf32>
    %10 = arith.mulf %2, %9 : vector<8x128xf32>
    %c0_5 = arith.constant 0 : index
    %c0_6 = arith.constant 0 : index
    %11 = vector.load %arg3[%c0_5, %c0_6] : memref<8x128xf32, #tpu.memory_space<vmem>>, vector<8x128xf32>
    tpu.vector_store %arg3[%c0_5, %c0_6], %10 {strides = array<i32>} : memref<8x128xf32, #tpu.memory_space<vmem>>, vector<8x128xf32>,
    return
  }
  func.func @transform_0(%arg0: i32) -> (i32, i32) {
    %c0_i32 = arith.constant 0 : i32
    %c0_i32_0 = arith.constant 0 : i32
    return %arg0, %c0_i32 : i32, i32
  }
  func.func @transform_1(%arg0: i32) -> (i32, i32) {
    %c0_i32 = arith.constant 0 : i32
    %c0_i32_0 = arith.constant 0 : i32
    %c0_i32_1 = arith.constant 0 : i32
    return %c0_i32, %c0_i32_0 : i32, i32
  }
  func.func @transform_2(%arg0: i32) -> (i32, i32) {
    %c0_i32 = arith.constant 0 : i32
    %c0_i32_0 = arith.constant 0 : i32
    return %arg0, %c0_i32 : i32, i32
  }
}

</mosaic_0001>

<bundles_post_ra>
// kernel: tpu_custom_call.1
= control target key start
LH: loop header
LB: loop body
LE: loop exit
PB: predicated region body
PF: predicated region fallthrough
CT: control target
= control target key end

     0   :  { %7 = vsyncpa [#allocation3], 0  ;;  %s759_s0 = inlined_call_operand.hbm [shape: f32[16,32], index: 0, kind: input, shape index: {}]   ;;  %s760_s1 = inlined_call_operand.hbm [shape: f32[32,128], index: 1, kind: input, shape index: {}]   ;;  %s761_s2 = inlined_call_operand.hbm [shape: f32[16,128], index: 2, kind: output, shape index: {}]  }
   0x1   :  { %9 = vsyncpa [#allocation3 + $0x1], 0 }
   0x2   :  { %10 = vsyncpa [#allocation6], 0 }
   0x3   :  { %11 = vsyncpa [#allocation4], 0 }
   0x4   :  { %13 = vsyncpa [#allocation4 + $0x1], 0  ;;  %s595_s9 = smov 0   ;;  %s597_s10 = smov 0  }
   0x5   :  { %s599_s11 = smov 0   ;;  %s601_s12 = smov 0  }
   0x6 LB: > { %s616_s13 = sadd.s32 4294967295, %s571_s12   ;;  %s355_s14 = sadd.s32 4294967294, %s571_s12   ;;  %s571_s12 = sphi %s601_s12, %s783_s12   ;;  %s567_s11 = sphi %s599_s11, %s782_s11   ;;  %s563_s10 = sphi %s597_s10, %s781_s10   ;;  %s559_s9 = sphi %s595_s9, %s780_s9  }
   0x7   : > { %p39_p0 = scmp.ne.s32.totalorder %s563_s10, %s559_s9  ;;  %p762_p1 = scmp.eq.s32.totalorder %s616_s13, 0 }
   0x8   : > { %p90_p3 = scmp.eq.s32.totalorder %s355_s14, 1  ;;  %p356_p5 = scmp.ge.s32.totalorder %s571_s12, 1 }
   0x9   : > { %p625_p4 = por %p762_p1, %p39_p0  ;;  %p97_p7 = scmp.lt.s32.totalorder %s571_s12, 3 }
   0xa   : > { %p630_p6 = por %p90_p3, %p39_p0  ;;  %s573_s18 = smov [#allocation5]  }
   0xb   : > { %s766_s15 = scalar_select %p625_p4, 1, 0 }
   0xc   : > { %s767_s16 = scalar_select %p630_p6, 1, 0 }
   0xd   : > { %p635_p8 = pnand %p356_p5, %p97_p7  ;;  %s109_s19 = sshll.u32 %s573_s18, 4  ;;  %s110_s19 = int_to_ptr.vmem [resolvable:$true] %s109_s19 }
   0xe   : > { %s649_s21 = sadd.s32 1, %s571_s12   ;;  %s26_s22 = sadd.s32 1, %s567_s11 }
   0xf   : > { %s768_s17 = scalar_select %p635_p8, 1, 0 }
  0x10   : > { %p394_p9 = pneg %p635_p8  ;;  %s23_s23 = ssub.s32 %s571_s12, %s649_s21 }
  0x11   : > { %s460_s24 = scalar_lea.vmem %s110_s19, 512  ;;  %p468_p5 = scmp.lt.s32.totalorder %s110_s19, %s110_s19 }
  0x12   : > { %p644_p11 = pnand %p394_p9, %p762_p1  ;;  %p461_p13 = scmp.ne.s32.totalorder %s110_s19, %s460_s24 }
  0x13   : > { %p469_p7 = scmp.lt.s32.totalorder %s460_s24, %s460_s24 }
  0x14   : > { %p451_p12 = pneg %p644_p11 }
  0x15   : > { %p470_p10 = por %p469_p7, %p468_p5 }
  0x16   : > { %p463_p0 = pnand %p461_p13, %p451_p12 }
  0x18   : > { %p464_p3 = pneg %p463_p0 }
  0x1a   : > { %p471_p2 = pnand %p470_p10, %p464_p3 }
  0x1c   : > { %474 = shalt.err (!%p471_p2)
}
  0x1d   : > { %s574_s25 = smov 128   ;;  %s575_s26 = smov 8  }
  0x1e   : > { %397 = dma.hbm_to_vmem [thread:$0]  (!%p644_p11), %s760_s1, 512, %s110_s19, [#allocation6], %s574_s25, %s574_s25, %s575_s26  }
  0x1f   : > { %p24_p9 = scmp.eq.s32.totalorder %s23_s23, 0  ;;  %p33_p12 = scmp.ne.s32.totalorder %s567_s11, %s563_s10 }
  0x20   : > { %p34_p10 = scmp.eq.s32.totalorder %s571_s12, 0  ;;  %p407_p2 = scmp.lt.s32.totalorder %s571_s12, 2 }
  0x21   : > { %s666_s29 = scalar_select %p24_p9, %s567_s11, %s26_s22  }
  0x22   : > { %p35_p13 = por %p34_p10, %p33_p12  ;;  %p770_p0 = scmp.eq.s32.totalorder %s616_s13, 1 }
  0x23   : > { %s123_s3 = sand.u32 1, %s567_s11   ;;  %s360_s4 = sshll.u32 %s571_s12, 7 }
  0x24   : > { %p670_p3 = por %p770_p0, %p33_p12  ;;  %s359_s5 = sshll.u32 %s123_s3, 3 }
  0x25   : > { %s679_s8 = scalar_lea.hbm %s759_s0, %s360_s4  ;;  %s127_s14 = scalar_lea.vmem [#allocation2], %s359_s5 }
  0x26   : > { %s771_s30 = scalar_select %p670_p3, 1, 0 }
  0x27   : > { %s134_s18 = sshll.u32 %s127_s14, 4  ;;  %p681_p11 = pnand %p407_p2, %p35_p13  ;;  %s135_s18 = int_to_ptr.vmem [resolvable:$true] %s134_s18 }
  0x28   : > { %s124_s20 = scalar_lea.sflag [#allocation3], %s123_s3  ;;  %s475_s22 = scalar_lea.hbm %s679_s8, 128 }
  0x29   : > { %p476_p5 = scmp.ne.s32.totalorder %s679_s8, %s475_s22  ;;  %p477_p7 = pneg %p681_p11 }
  0x2a   : > { %s480_s25 = scalar_lea.hbm %s759_s0, 256  ;;  %p481_p10 = scmp.lt.s32.totalorder %s679_s8, %s759_s0 }
  0x2b   : > { %p478_p9 = pnand %p477_p7, %p476_p5  ;;  %p482_p2 = scmp.lt.s32.totalorder %s480_s25, %s475_s22 }
  0x2d   : > { %p479_p12 = pneg %p478_p9  ;;  %p483_p13 = por %p482_p2, %p481_p10 }
  0x2f   : > { %p484_p0 = pnand %p483_p13, %p479_p12 }
  0x31   : > { %487 = shalt.err (!%p484_p0)
}
  0x32   : > { %s488_s28 = scalar_lea.vmem %s135_s18, 128  ;;  %s576_s3 = smov [#allocation2]  }
  0x33   : > { %p489_p1 = scmp.ne.s32.totalorder %s135_s18, %s488_s28  ;;  %s493_s4 = sshll.u32 %s576_s3, 4  ;;  %s494_s4 = int_to_ptr.vmem [resolvable:$false] %s493_s4 }
  0x34   : > { %s495_s5 = scalar_lea.vmem %s494_s4, 256  ;;  %p496_p5 = scmp.lt.s32.totalorder %s135_s18, %s494_s4 }
  0x35   : > { %p491_p6 = pnand %p489_p1, %p477_p7  ;;  %p497_p9 = scmp.lt.s32.totalorder %s495_s5, %s488_s28 }
  0x37   : > { %p492_p3 = pneg %p491_p6  ;;  %p498_p4 = por %p497_p9, %p496_p5 }
  0x39   : > { %p499_p8 = pnand %p498_p4, %p492_p3 }
  0x3b   : > { %502 = shalt.err (!%p499_p8)
}
  0x3c   : > { %401 = dma.hbm_to_vmem [thread:$0]  (!%p681_p11), %s679_s8, 128, %s135_s18, %s124_s20  }
  0x3d   : > { %p773_p12 = scmp.ne.s32.totalorder %s768_s17, 0 }
  0x3e   : > { %s702_s6 = sand.u32 (!%p773_p12), 1, %s563_s10   ;;  %p774_p1 = scmp.ne.s32.totalorder (!%p773_p12), %s766_s15, 0 }
  0x3f   : > { %143 = sbr.rel (%p773_p12) target bundleno = 289 (0x121), region = 28  ;;  %s362_s7 = sshll.u32 (!%p773_p12), %s702_s6, 3 }
  0x40   : > { %s146_s14 = scalar_lea.sflag (!%p773_p12), [#allocation3], %s702_s6  ;;  %s149_s22 = scalar_lea.vmem (!%p773_p12), [#allocation2], %s362_s7 }
  0x44   : > { %546 = dma.done.wait (%p774_p1), %s146_s14, 128  }
  0x45   : > { %548 = vsyncadd (%p774_p1), %s146_s14, 4294967168  ;;  %p775_p4 = scmp.eq.s32.totalorder %s616_s13, 0 }
  0x47   : > { %550 = dma.done.wait (%p775_p4), [#allocation6], 512   ;;  %p776_p6 = pmov %p775_p4 }
  0x48   : > { %v577_v0 = vmov 0.0   ;;  %vm578_vm0 = vmmov 0   ;;  %v178_v1 = vld [vmem:[#allocation5 + $0x18] sm:$0xff]  ;;  %v177_v2 = vld [vmem:[#allocation5 + $0x10] sm:$0xff]  ;;  %v176_v4 = vld [vmem:[#allocation5 + $0x8] sm:$0xff]  ;;  %vm179_vm1 = vcmask 261120  }
  0x49   : > { %552 = vsyncadd (%p776_p6), [#allocation6], 4294966784  ;;  %375 = vmatprep.subr.mxu0 %v577_v0  ;;  %383 = vmatprep.mubr.msk.f32.mxu0 %vm578_vm0, %v577_v0  ;;  %v174_v3 = vld [vmem:[%s149_s22] sm:$0xff]  ;;  %v175_v6 = vld [vmem:[#allocation5] sm:$0xff]  ;;  %s367_s15 = sshll.u32 %s616_s13, 7  ;;  %s173_s17 = scalar_lea.vmem [#allocation7], %s362_s7 }
  0x4a   : > { %376 = vmatpush3.msra.mxu0 %v178_v1  ;;  %v253_v5 = vmul.f32 %v174_v3, %v174_v3  ;;  %s275_s8 = sshll.u32 %s173_s17, 4  ;;  %s722_s20 = scalar_lea.hbm %s761_s2, %s367_s15  ;;  %s276_s8 = int_to_ptr.vmem [resolvable:$true] %s275_s8 }
  0x4b   : > { %377 = vmatprep.subr.mxu0 %v577_v0  ;;  %s262_s23 = scalar_lea.sflag [#allocation4], %s702_s6  ;;  %s503_s24 = scalar_lea.vmem %s276_s8, 128 }
  0x4c   : > { %378 = vmatpush3.msra.mxu0 %v177_v2  ;;  %v254_v7 = vsel %vm179_vm1, %v253_v5, 0.0  ;;  %p504_p8 = scmp.ne.s32.totalorder %s276_s8, %s503_s24  ;;  %p777_p3 = scmp.ne.s32.totalorder %s771_s30, 0 }
  0x4d   : > { %379 = vmatprep.subr.mxu0 %v577_v0  ;;  %255 = vadd.xlane.f32.xlu0 %v254_v7  ;;  %s579_s13 = smov [#allocation7]  }
  0x4e   : > { %380 = vmatpush3.msra.mxu0 %v176_v4  ;;  %p505_p11 = pnand %p504_p8, %p777_p3  ;;  %s507_s25 = sshll.u32 %s579_s13, 4  ;;  %s508_s25 = int_to_ptr.vmem [resolvable:$false] %s507_s25 }
  0x4f   : > { %381 = vmatprep.subr.mxu0 %v577_v0  ;;  %s509_s26 = scalar_lea.vmem %s508_s25, 256  ;;  %p510_p10 = scmp.lt.s32.totalorder %s276_s8, %s508_s25 }
  0x50   : > { %382 = vmatpush3.msra.mxu0 %v175_v6  ;;  %p506_p7 = pneg %p505_p11  ;;  %p511_p2 = scmp.lt.s32.totalorder %s509_s26, %s503_s24 }
  0x51   : > { %384 = vmatmul.mubr.msk.f32.vlgmr.msra.gmra.mxu0 %vm179_vm1, %v174_v3 }
  0x52   : > { %p512_p13 = por %p511_p2, %p510_p10 }
  0x54   : > { %p513_p0 = pnand %p512_p13, %p506_p7 }
  0xd6   : > { %v256_v8 = vpop.xlane.xlu0 %255 }
  0xd7   : > { %v257_v9 = vmax.f32 %v256_v8, 1e-24 }
  0xd9   : > { %447 = vrsqrt.f32 %v257_v9 }
  0xe6   : > { %v448_v10 = vpop.eup %447 }
 0x111   : > { %v249_v11 = vpop.f32.mrf.mxu0 }
 0x112   : > { %v259_v12 = vmul.f32 %v448_v10, %v249_v11 }
 0x113   : > { %v385_v13 = vpop.f32.mrf.mxu0 }
 0x114   : > { %260 = vst [vmem:[%s173_s17] sm:$0xff] %v259_v12 }
 0x115   : > { %516 = shalt.err (!%p513_p0)
}
 0x116   : > { %s517_s27 = scalar_lea.hbm %s722_s20, 128  ;;  %s521_s4 = scalar_lea.hbm %s761_s2, 256 }
 0x117   : > { %p518_p5 = scmp.ne.s32.totalorder %s722_s20, %s517_s27  ;;  %p522_p1 = scmp.lt.s32.totalorder %s722_s20, %s761_s2 }
 0x118   : > { %p523_p4 = scmp.lt.s32.totalorder %s521_s4, %s517_s27 }
 0x119   : > { %p519_p9 = pnand %p518_p5, %p777_p3 }
 0x11a   : > { %p524_p6 = por %p523_p4, %p522_p1 }
 0x11b   : > { %p520_p12 = pneg %p519_p9 }
 0x11d   : > { %p525_p8 = pnand %p524_p6, %p520_p12 }
 0x11f   : > { %528 = shalt.err (!%p525_p8)
}
 0x120   : > { %392 = dma.vmem_to_hbm [thread:$0]  (%p777_p3), %s276_s8, 128, %s722_s20, %s262_s23  }
 0x121 PF: > { %s287_s7 = sand.u32 1, %s559_s9   ;;  %p778_p11 = scmp.ne.s32.totalorder %s767_s16, 0 }
 0x122   : > { %p779_p7 = scmp.ge.s32.totalorder %s571_s12, 2  ;;  %s288_s14 = scalar_lea.sflag [#allocation4], %s287_s7 }
 0x124   : > { %p403_p10 = pnand %p779_p7, %p778_p11 }
 0x126   : > { %p404_p2 = pneg %p403_p10 }
 0x128   : > { %554 = dma.done.wait (%p404_p2), %s288_s14, 128  }
 0x129   : > { %556 = vsyncadd (%p404_p2), %s288_s14, 4294967168  ;;  %p16_p13 = scmp.ge.s32.totalorder %s649_s21, 4   ;;  %s780_s9 = smov %s563_s10 }
 0x12a   : > { %s781_s10 = smov %s567_s11  ;;  %s782_s11 = smov %s666_s29 }
 0x12b   : > { %s783_s12 = smov %s649_s21  ;;  %18 = sbr.rel (!%p16_p13) target bundleno = 6 (0x6), region = 77 }
 0x130   :  { %293 = vsyncpa [#allocation3], 1 }
 0x131   :  { %295 = vsyncpa [#allocation3 + $0x1], 1 }
 0x132   :  { %296 = vsyncpa [#allocation6], 1 }
 0x133   :  { %297 = vsyncpa [#allocation4], 1 }
 0x134   :  { %299 = vsyncpa [#allocation4 + $0x1], 1 }

</bundles_post_ra>
